<compile_context>
chip_gen: v7x
topology: tpu7x:2x2x1
jax: 0.10.0
libtpu: 0.0.40
codegen_flags: <defaults>
</compile_context>

<pallas_src>
import numpy as np
import jax
import jax.numpy as jnp
from jax.experimental import pallas as pl
from jax.experimental.pallas import tpu as pltpu


def _build_positional_encoding_weight(d_model: int, max_len: int) -> np.ndarray:
    """Vectorized, exact reproduction of AddPositionalEncoding._initialize_weight.

    pos in [1, max_len], i in [1, d_model]:
        w = pos / 10000 ** ((2 * i // 2) / d_model)   # == pos / 10000**(i/d_model)
        pe[pos-1, i-1] = sin(w) if i % 2 == 0 else cos(w)
    (Faithful to the module as written, including its non-Vaswani exponent.)
    """
    pos = np.arange(1, max_len + 1, dtype=np.float64)[:, None]        # (max_len, 1)
    i = np.arange(1, d_model + 1, dtype=np.int64)[None, :]            # (1, d_model)
    w = pos / np.power(10000.0, i.astype(np.float64) / d_model)       # (max_len, d_model)
    pe = np.where(i % 2 == 0, np.sin(w), np.cos(w))
    return pe.astype(np.float32)


def _add_pe_kernel(x_ref, pe_ref, o_ref):
    # x_ref / o_ref: (TR, LANE) block (batch dim squeezed away)
    # pe_ref:        (TR, LANE) block, resident across the inner batch loop
    o_ref[...] = (x_ref[...] + pe_ref[...]).astype(o_ref.dtype)


def _choose_lane_width(n: int, cap: int = 1024) -> int:
    """Largest multiple of 128 (<= cap) that evenly divides n.

    Caller guarantees n % 128 == 0, so this always terminates at >= 128.
    """
    lane = min(cap, n)
    lane -= lane % 128
    while lane >= 128:
        if n % lane == 0:
            return lane
        lane -= 128
    return 128  # unreachable when n % 128 == 0


def add_positional_encoding(
    x: jax.Array,
    pe_weight: jax.Array,
    *,
    tile_bytes: int = 4 * 1024 * 1024,
    jax_fallback_max_bytes: int = 0,
) -> jax.Array:
    """x: (B, S, D); pe_weight: (max_len, D). Returns x + pe[:S] (broadcast over B)."""
    assert x.ndim == 3, f"expected (batch, seq, d_model), got {x.shape}"
    b, s, d = x.shape
    max_len, d_pe = pe_weight.shape
    assert d_pe == d, f"d_model mismatch: x has {d}, pe has {d_pe}"
    assert s <= max_len, f"seq_len={s} exceeds max_len={max_len}"

    # Match the input dtype (halves pe HBM traffic / removes converts for bf16).
    pe = pe_weight[:s, :].astype(x.dtype)

    itemsize = jnp.dtype(x.dtype).itemsize
    # Tiny-shape fast path (launch + pipeline overhead dominates). Disabled by
    # default; set e.g. jax_fallback_max_bytes=2<<20 in production.
    if jax_fallback_max_bytes and b * s * d * itemsize <= jax_fallback_max_bytes:
        return x + pe[None, :, :]

    # Dtype-aware sublane alignment: 8 for f32, 16 for bf16, 32 for int8/fp8.
    sub_align = max(8, 32 // itemsize)

    n = s * d
    if n % 128 == 0:
        # Lane-dense fused layout: (B, S, D) -> (B, rows, lane), lane % 128 == 0.
        lane = _choose_lane_width(n)
        rows = n // lane
        x2 = x.reshape(b, rows, lane)
        pe2 = pe.reshape(rows, lane)
    else:
        # Rare fallback (S*D not a multiple of 128): keep the full-D lane block;
        # block last dim equals the full array extent, so it stays legal
        # (stores are masked partial vst, correctness unaffected).
        lane = d
        rows = s
        x2 = x
        pe2 = pe

    # Row tile targeting ~tile_bytes per tile (cdiv grid, ragged tail is masked).
    target_rows = max(sub_align, tile_bytes // max(1, lane * itemsize))
    if rows <= target_rows:
        tr = rows                                   # full extent -> always legal
    else:
        tr = (target_rows // sub_align) * sub_align  # aligned, fixed-size tile

    grid = (pl.cdiv(rows, tr), b)  # batch innermost -> pe tile not re-fetched per batch

    out = pl.pallas_call(
        _add_pe_kernel,
        out_shape=jax.ShapeDtypeStruct((b, rows, lane), x.dtype),
        grid=grid,
        in_specs=[
            pl.BlockSpec((pl.Squeezed(), tr, lane), lambda r, bi: (bi, r, 0)),
            pl.BlockSpec((tr, lane), lambda r, bi: (r, 0)),
        ],
        out_specs=pl.BlockSpec((pl.Squeezed(), tr, lane), lambda r, bi: (bi, r, 0)),
        compiler_params=pltpu.CompilerParams(
            # All output blocks are disjoint -> both axes parallel.  On v7x this
            # lets megacore shard the batch axis even when the row grid is 1;
            # each core's batch range is still consecutive, so pe is fetched at
            # most once per core.
            dimension_semantics=("parallel", "parallel"),
            # 3 arrays x 2 buffers x ~4 MiB tiles ~= 24 MiB; 48 MiB leaves
            # headroom under v7x's 64 MiB physical VMEM (trivial on v5e/v6e).
            vmem_limit_bytes=48 * 1024 * 1024,
        ),
        cost_estimate=pl.CostEstimate(
            flops=b * n,
            transcendentals=0,
            bytes_accessed=(2 * b * n + n) * itemsize,
        ),
    )(x2, pe2)

    return out.reshape(b, s, d)


if __name__ == "__main__":
    key = jax.random.PRNGKey(0)

    # --- Case 1: the module-sized example (d_model=32 < 128 -> lane-dense fused path).
    d_model, max_len, batch, seq_len = 32, 16, 2, 8
    pe_w = jnp.asarray(_build_positional_encoding_weight(d_model, max_len))
    k1, k2, k3 = jax.random.split(key, 3)
    x = jax.random.normal(k1, (batch, seq_len, d_model), dtype=jnp.float32)
    out = jax.block_until_ready(add_positional_encoding(x, pe_w))
    ref = x + pe_w[:seq_len, :][None, :, :]
    np.testing.assert_allclose(np.asarray(out), np.asarray(ref), rtol=1e-6, atol=1e-6)

    # --- Case 2: ragged cdiv tiling (rows not divisible by the row tile).
    d2, max2, b2, s2 = 1024, 32, 2, 20
    pe_w2 = jnp.asarray(_build_positional_encoding_weight(d2, max2))
    x2 = jax.random.normal(k2, (b2, s2, d2), dtype=jnp.float32)
    out2 = jax.block_until_ready(
        add_positional_encoding(x2, pe_w2, tile_bytes=32 * 1024)
    )
    ref2 = x2 + pe_w2[:s2, :][None, :, :]
    np.testing.assert_allclose(np.asarray(out2), np.asarray(ref2), rtol=1e-6, atol=1e-6)

    # --- Case 3: S*D not a multiple of 128 -> full-D masked-store fallback path.
    d3, max3, b3, s3 = 24, 8, 3, 5
    pe_w3 = jnp.asarray(_build_positional_encoding_weight(d3, max3))
    x3 = jax.random.normal(k3, (b3, s3, d3), dtype=jnp.float32)
    out3 = jax.block_until_ready(add_positional_encoding(x3, pe_w3))
    ref3 = x3 + pe_w3[:s3, :][None, :, :]
    np.testing.assert_allclose(np.asarray(out3), np.asarray(ref3), rtol=1e-6, atol=1e-6)

    # --- Case 4: tiny-shape plain-JAX fast path (wrapper-level, no kernel).
    out4 = jax.block_until_ready(
        add_positional_encoding(x, pe_w, jax_fallback_max_bytes=1 << 20)
    )
    np.testing.assert_allclose(np.asarray(out4), np.asarray(ref), rtol=1e-6, atol=1e-6)

    print("KERNEL_OK")
</pallas_src>

<mosaic_0001>
module attributes {stable_mosaic.version = 11 : i64} {
  func.func @_add_pe_kernel(%arg0: i32, %arg1: i32, %arg2: memref<1x1x256xf32, #tpu.memory_space<vmem>>, %arg3: memref<1x256xf32, #tpu.memory_space<vmem>>, %arg4: memref<1x1x256xf32, #tpu.memory_space<vmem>>) attributes {dimension_semantics = [#tpu.dimension_semantics<parallel>, #tpu.dimension_semantics<parallel>], iteration_bounds = array<i64: 1, 2>, scalar_prefetch = 0 : i64, scratch_operands = 0 : i64, tpu.core_type = #tpu.core_type<tc>, window_params = [{transform_indices = @transform_0, window_bounds = array<i64: 1, 1, 256>}, {transform_indices = @transform_1, window_bounds = array<i64: 1, 256>}, {transform_indices = @transform_2, window_bounds = array<i64: 1, 1, 256>}]} {
    %c0 = arith.constant 0 : index
    %c0_0 = arith.constant 0 : index
    %c0_1 = arith.constant 0 : index
    %0 = vector.load %arg2[%c0, %c0_0, %c0_1] : memref<1x1x256xf32, #tpu.memory_space<vmem>>, vector<1x1x256xf32>
    %1 = vector.shape_cast %0 : vector<1x1x256xf32> to vector<1x256xf32>
    %c0_2 = arith.constant 0 : index
    %c0_3 = arith.constant 0 : index
    %2 = vector.load %arg3[%c0_2, %c0_3] : memref<1x256xf32, #tpu.memory_space<vmem>>, vector<1x256xf32>
    %3 = arith.addf %1, %2 : vector<1x256xf32>
    %c0_4 = arith.constant 0 : index
    %c0_5 = arith.constant 0 : index
    %c0_6 = arith.constant 0 : index
    %4 = vector.load %arg4[%c0_4, %c0_5, %c0_6] : memref<1x1x256xf32, #tpu.memory_space<vmem>>, vector<1x1x256xf32>
    %5 = vector.shape_cast %4 : vector<1x1x256xf32> to vector<1x256xf32>
    %6 = vector.shape_cast %3 : vector<1x256xf32> to vector<1x1x256xf32>
    tpu.vector_store %arg4[%c0_4, %c0_5, %c0_6], %6 {strides = array<i32>} : memref<1x1x256xf32, #tpu.memory_space<vmem>>, vector<1x1x256xf32>,
    return
  }
  func.func @transform_0(%arg0: i32, %arg1: i32) -> (i32, i32, i32) {
    %c0_i32 = arith.constant 0 : i32
    %c0_i32_0 = arith.constant 0 : i32
    return %arg1, %arg0, %c0_i32 : i32, i32, i32
  }
  func.func @transform_1(%arg0: i32, %arg1: i32) -> (i32, i32) {
    %c0_i32 = arith.constant 0 : i32
    %c0_i32_0 = arith.constant 0 : i32
    return %arg0, %c0_i32 : i32, i32
  }
  func.func @transform_2(%arg0: i32, %arg1: i32) -> (i32, i32, i32) {
    %c0_i32 = arith.constant 0 : i32
    %c0_i32_0 = arith.constant 0 : i32
    return %arg1, %arg0, %c0_i32 : i32, i32, i32
  }
}

</mosaic_0001>

<bundles_post_ra>
// kernel: tpu_custom_call.1
= control target key start
LH: loop header
LB: loop body
LE: loop exit
PB: predicated region body
PF: predicated region fallthrough
CT: control target
= control target key end

     0   :  { %7 = vsyncpa [#allocation3], 0  ;;  %s705_s0 = inlined_call_operand.hbm [shape: f32[2,1,256], index: 0, kind: input, shape index: {}]   ;;  %s706_s1 = inlined_call_operand.vmem [shape: f32[1,256], index: 1, kind: input, shape index: {}]   ;;  %s707_s2 = inlined_call_operand.hbm [shape: f32[2,1,256], index: 2, kind: output, shape index: {}]  }
   0x1   :  { %9 = vsyncpa [#allocation3 + $0x1], 0 }
   0x2   :  { %10 = vsyncpa [#allocation4], 0 }
   0x3   :  { %12 = vsyncpa [#allocation4 + $0x1], 0  ;;  %s530_s9 = smov 0   ;;  %s532_s10 = smov 0  }
   0x4   :  { %s534_s11 = smov 0   ;;  %s536_s12 = smov 0  }
   0x5   :  { %s538_s13 = smov 0   ;;  %s540_s14 = smov 0  }
   0x6 LB: > { %s319_s15 = sadd.s32 4294967295, %s511_s14   ;;  %s320_s16 = sadd.s32 4294967294, %s511_s14   ;;  %s511_s14 = sphi %s540_s14, %s18_s14   ;;  %s507_s13 = sphi %s538_s13, %s723_s13   ;;  %s503_s12 = sphi %s536_s12, %s722_s12   ;;  %s499_s11 = sphi %s534_s11, %s721_s11   ;;  %s495_s10 = sphi %s532_s10, %s720_s10   ;;  %s491_s9 = sphi %s530_s9, %s719_s9  }
   0x7   : > { %s27_s17 = sadd.s32 1, %s507_s13  ;;  %s39_s18 = sadd.s32 1, %s499_s11 }
   0x8   : > { %p28_p0 = scmp.ge.s32.totalorder %s27_s17, 2  ;;  %p46_p1 = scmp.ne.s32.totalorder %s499_s11, %s495_s10 }
   0x9   : > { %p47_p2 = scmp.eq.s32.totalorder %s511_s14, 0  ;;  %p52_p3 = scmp.ne.s32.totalorder %s495_s10, %s491_s9 }
   0xa   : > { %s725_s17 = smov (%p28_p0, %s27_s17), 0  ;;  %p53_p5 = scmp.eq.s32.totalorder %s319_s15, 0 }
   0xb   : > { %p571_p4 = por %p47_p2, %p46_p1  ;;  %s34_s20 = ssub.s32 %s507_s13, %s725_s17 }
   0xc   : > { %p104_p6 = scmp.eq.s32.totalorder %s319_s15, 1  ;;  %p37_p7 = scmp.eq.s32.totalorder %s34_s20, 0 }
   0xd   : > { %p577_p8 = por %p53_p5, %p52_p3  ;;  %p110_p10 = scmp.eq.s32.totalorder %s320_s16, 1 }
   0xe   : > { %p581_p9 = por %p104_p6, %p46_p1  ;;  %p349_p13 = scmp.lt.s32.totalorder %s511_s14, 2 }
   0xf   : > { %s586_s23 = scalar_select %p37_p7, %s499_s11, %s39_s18  }
  0x10   : > { %s711_s22 = scalar_select %p581_p9, 1, 0 }
  0x11   : > { %p588_p11 = por %p110_p10, %p52_p3  ;;  %s137_s25 = sand.u32 1, %s499_s11  }
  0x12   : > { %s324_s26 = sshll.u32 %s137_s25, 1  ;;  %s335_s27 = sshll.u32 %s507_s13, 5 }
  0x13   : > { %s712_s24 = scalar_select %p588_p11, 1, 0 }
  0x14   : > { %s599_s30 = scalar_lea.hbm %s705_s0, %s335_s27  ;;  %s141_s3 = scalar_lea.vmem [#allocation2], %s324_s26 }
  0x15   : > { %s151_s4 = sshll.u32 %s141_s3, 4  ;;  %p605_p0 = pnand %p349_p13, %p571_p4  ;;  %s601_s4 = int_to_ptr.vmem [resolvable:$true] %s151_s4 }
  0x16   : > { %s138_s6 = scalar_lea.sflag [#allocation3], %s137_s25  ;;  %s399_s7 = scalar_lea.hbm %s599_s30, 32 }
  0x17   : > { %p400_p3 = scmp.ne.s32.totalorder %s599_s30, %s399_s7  ;;  %p401_p5 = pneg %p605_p0 }
  0x18   : > { %s404_s16 = scalar_lea.hbm %s705_s0, 64  ;;  %p405_p4 = scmp.lt.u32.totalorder %s599_s30, %s705_s0 }
  0x19   : > { %p402_p6 = pnand %p401_p5, %p400_p3  ;;  %p406_p10 = scmp.lt.u32.totalorder %s404_s16, %s399_s7 }
  0x1a   : > { %p408_p12 = scmp.lt.u32.totalorder %s399_s7, %s599_s30 }
  0x1b   : > { %p403_p7 = pneg %p402_p6  ;;  %p407_p13 = por %p406_p10, %p405_p4 }
  0x1d   : > { %p409_p1 = por %p408_p12, %p407_p13 }
  0x1f   : > { %p410_p2 = pnand %p409_p1, %p403_p7 }
  0x21   : > { %413 = shalt.err (!%p410_p2)
}
  0x22   : > { %s414_s20 = scalar_lea.vmem %s601_s4, 32  ;;  %s513_s25 = smov [#allocation2]  }
  0x23   : > { %p415_p3 = scmp.ne.s32.totalorder %s601_s4, %s414_s20  ;;  %s419_s26 = sshll.u32 %s513_s25, 4  ;;  %s420_s26 = int_to_ptr.vmem [resolvable:$false] %s419_s26 }
  0x24   : > { %s421_s27 = scalar_lea.vmem %s420_s26, 64  ;;  %p422_p9 = scmp.lt.s32.totalorder %s601_s4, %s420_s26 }
  0x25   : > { %p417_p6 = pnand %p415_p3, %p401_p5  ;;  %p423_p4 = scmp.lt.s32.totalorder %s421_s27, %s414_s20 }
  0x27   : > { %p418_p11 = pneg %p417_p6  ;;  %p424_p10 = por %p423_p4, %p422_p9 }
  0x29   : > { %p425_p12 = pnand %p424_p10, %p418_p11 }
  0x2b   : > { %428 = shalt.err (!%p425_p12)
}
  0x2c   : > { %344 = dma.hbm_to_vmem [thread:$0]  (!%p605_p0), %s599_s30, 32, %s601_s4, %s138_s6  }
  0x2d   : > { %p714_p1 = scmp.lt.s32.totalorder %s511_s14, 3  ;;  %p715_p2 = scmp.ge.s32.totalorder %s511_s14, 1 }
  0x2f   : > { %p157_p5 = pnand %p715_p2, %p714_p1 }
  0x30   : > { %s641_s28 = sand.u32 (!%p157_p5), 1, %s495_s10  }
  0x31   : > { %160 = sbr.rel (%p157_p5) target bundleno = 83 (0x53), region = 28  ;;  %s328_s29 = sshll.u32 (!%p157_p5), %s641_s28, 1 }
  0x32   : > { %s163_s3 = scalar_lea.sflag (!%p157_p5), [#allocation3], %s641_s28  ;;  %s166_s7 = scalar_lea.vmem (!%p157_p5), [#allocation2], %s328_s29 }
  0x38   : > { %482 = dma.done.wait (%p577_p8), %s163_s3, 32  }
  0x39   : > { %484 = vsyncadd (%p577_p8), %s163_s3, 4294967264  ;;  %v198_v0 = vlaneseq  ;;  %s190_s30 = scalar_lea.vmem [#allocation5], %s328_s29  ;;  %s336_s5 = sshll.u32 %s503_s12, 5  ;;  %v195_v1 = vld [vmem:[%s166_s7] sm:$0x3] }
  0x3a   : > { %s220_s4 = sshll.u32 %s190_s30, 4  ;;  %v196_v2 = vld [vmem:[%s706_s1] sm:$0x3]  ;;  %s658_s21 = scalar_lea.hbm %s707_s2, %s336_s5  ;;  %s653_s4 = int_to_ptr.vmem [resolvable:$true] %s220_s4 }
  0x3b   : > { %vm200_vm0 = vcmp.lt.s32.totalorder %v198_v0, 256  ;;  %v197_v3 = vadd.f32 %v196_v2, %v195_v1  ;;  %s204_s18 = scalar_lea.sflag [#allocation4], %s641_s28  ;;  %s429_s12 = scalar_lea.vmem %s653_s4, 32 }
  0x3c   : > { %p430_p8 = scmp.ne.s32.totalorder %s653_s4, %s429_s12  ;;  %p716_p9 = scmp.ne.s32.totalorder %s711_s22, 0 }
  0x3d   : > { %202 = vst.msk [vmem:[%s190_s30] sm:$0x3] %vm200_vm0, %v197_v3  ;;  %s514_s19 = smov [#allocation5]  }
  0x3e   : > { %p431_p11 = pnand %p430_p8, %p716_p9  ;;  %s433_s20 = sshll.u32 %s514_s19, 4  ;;  %s434_s20 = int_to_ptr.vmem [resolvable:$false] %s433_s20 }
  0x3f   : > { %s435_s25 = scalar_lea.vmem %s434_s20, 64  ;;  %p436_p7 = scmp.lt.s32.totalorder %s653_s4, %s434_s20 }
  0x40   : > { %p432_p0 = pneg %p431_p11  ;;  %p437_p13 = scmp.lt.s32.totalorder %s435_s25, %s429_s12 }
  0x42   : > { %p438_p3 = por %p437_p13, %p436_p7 }
  0x44   : > { %p439_p6 = pnand %p438_p3, %p432_p0 }
  0x46   : > { %442 = shalt.err (!%p439_p6)
}
  0x47   : > { %s443_s26 = scalar_lea.hbm %s658_s21, 32  ;;  %s447_s29 = scalar_lea.hbm %s707_s2, 64 }
  0x48   : > { %p444_p4 = scmp.ne.s32.totalorder %s658_s21, %s443_s26  ;;  %p448_p1 = scmp.lt.u32.totalorder %s658_s21, %s707_s2 }
  0x49   : > { %p449_p2 = scmp.lt.u32.totalorder %s447_s29, %s443_s26  ;;  %p451_p8 = scmp.lt.u32.totalorder %s443_s26, %s658_s21 }
  0x4a   : > { %p445_p10 = pnand %p444_p4, %p716_p9 }
  0x4b   : > { %p450_p5 = por %p449_p2, %p448_p1 }
  0x4c   : > { %p446_p12 = pneg %p445_p10 }
  0x4d   : > { %p452_p11 = por %p451_p8, %p450_p5 }
  0x4f   : > { %p453_p0 = pnand %p452_p11, %p446_p12 }
  0x51   : > { %456 = shalt.err (!%p453_p0)
}
  0x52   : > { %339 = dma.vmem_to_hbm [thread:$0]  (%p716_p9), %s653_s4, 32, %s658_s21, %s204_s18  }
  0x53 PF: > { %s232_s30 = sand.u32 1, %s491_s9   ;;  %p717_p7 = scmp.ne.s32.totalorder %s712_s24, 0 }
  0x54   : > { %p718_p13 = scmp.ge.s32.totalorder %s511_s14, 2  ;;  %s233_s5 = scalar_lea.sflag [#allocation4], %s232_s30 }
  0x56   : > { %p346_p3 = pnand %p718_p13, %p717_p7 }
  0x58   : > { %486 = dma.done.wait (!%p346_p3), %s233_s5, 32  }
  0x59   : > { %488 = vsyncadd (!%p346_p3), %s233_s5, 4294967264  ;;  %s18_s14 = sadd.s32 1, %s511_s14   ;;  %s719_s9 = smov %s495_s10 }
  0x5a   : > { %p15_p6 = scmp.ge.s32.totalorder %s18_s14, 4   ;;  %s720_s10 = smov %s499_s11 }
  0x5b   : > { %s721_s11 = smov %s586_s23  ;;  %s722_s12 = smov %s507_s13 }
  0x5c   : > { %s723_s13 = smov %s725_s17  ;;  %17 = sbr.rel (!%p15_p6) target bundleno = 6 (0x6), region = 76 }
  0x63   :  { %238 = vsyncpa [#allocation3], 1 }
  0x64   :  { %240 = vsyncpa [#allocation3 + $0x1], 1 }
  0x65   :  { %241 = vsyncpa [#allocation4], 1 }
  0x66   :  { %243 = vsyncpa [#allocation4 + $0x1], 1 }

</bundles_post_ra>
